<compile_context>
chip_gen: v6e
topology: v6e:2x2x1
jax: 0.10.0
libtpu: 0.0.40
codegen_flags: <defaults>
</compile_context>

<pallas_src>
import functools

import jax
import jax.numpy as jnp
from jax import lax
from jax.experimental import pallas as pl
from jax.experimental.pallas import tpu as pltpu

LOG_STD_MAX = 2.0
LOG_STD_MIN = -5.0

HIDDEN = 256
MAX_BATCH_TILE = 2048     # v5e/v6e: large tiles amortize per-step overhead (~few MiB VMEM/step)
SPLIT_BATCH = 256         # B >= this: force grid >= 2 so v7x's 2 TCs both get work
OUT_DTYPE = jnp.float32   # flip to jnp.bfloat16 if downstream tolerates it (halves writeback)


def _round_up(n, m):
    return ((n + m - 1) // m) * m


def actor_kernel(x_ref, w1_ref, b1_ref, w2_ref, b2_ref, wh_ref, bh_ref, out_ref):
    w1 = w1_ref[...]
    cdt = w1.dtype                      # matmul-input dtype (bf16 by default, f32 optional)

    x = x_ref[...].astype(cdt)

    # fc1 + ReLU  (intermediate kept in cdt -> bf16 halves spilled bytes on v5e)
    h1 = jnp.dot(x, w1, preferred_element_type=jnp.float32) + b1_ref[...]
    h1 = jnp.maximum(h1, 0.0).astype(cdt)

    # fc2 + ReLU
    h2 = jnp.dot(h1, w2_ref[...], preferred_element_type=jnp.float32) + b2_ref[...]
    h2 = jnp.maximum(h2, 0.0).astype(cdt)

    # fused heads: [mean | log_std] in one lane-dense matmul, one output slab
    head = jnp.dot(h2, wh_ref[...], preferred_element_type=jnp.float32) + bh_ref[...]

    half = wh_ref.shape[1] // 2
    log_std = jnp.tanh(head)            # EUP slot (free next to MXU/VPU work)
    log_std = LOG_STD_MIN + 0.5 * (LOG_STD_MAX - LOG_STD_MIN) * (log_std + 1.0)
    lane = lax.broadcasted_iota(jnp.int32, head.shape, 1)
    out = jnp.where(lane >= half, log_std, head)

    out_ref[...] = out.astype(out_ref.dtype)


def pack_actor_params(params, matmul_dtype=jnp.bfloat16):
    """Fuse + lane-pad the head weights and pre-cast matmul weights ONCE."""
    w1, b1, w2, b2, wm, bm, ws, bs = params
    b1 = jnp.asarray(b1, jnp.float32).reshape(1, -1)
    b2 = jnp.asarray(b2, jnp.float32).reshape(1, -1)
    bm = jnp.asarray(bm, jnp.float32).reshape(1, -1)
    bs = jnp.asarray(bs, jnp.float32).reshape(1, -1)

    obs_dim = w1.shape[0]
    act_dim = wm.shape[1]
    assert act_dim <= 128, "act_dim > 128 not supported by this packing"

    # act_dim <= 64 -> pack mean|log_std into a single 128-lane output;
    # otherwise each head gets 128 lanes (256-lane output slab).
    head_half = 64 if act_dim <= 64 else 128
    pad = head_half - act_dim

    # pad obs_dim (K of fc1) to a multiple of 8 sublanes
    k_pad = max(8, _round_up(obs_dim, 8))
    w1p = jnp.pad(w1, ((0, k_pad - obs_dim), (0, 0)))

    wh = jnp.concatenate(
        [jnp.pad(wm, ((0, 0), (0, pad))), jnp.pad(ws, ((0, 0), (0, pad)))], axis=1)
    bh = jnp.concatenate(
        [jnp.pad(bm, ((0, 0), (0, pad))), jnp.pad(bs, ((0, 0), (0, pad)))], axis=1)

    # pre-cast matmul inputs (weights) once; biases stay f32 (post-accumulation add)
    w1p = w1p.astype(matmul_dtype)
    w2c = jnp.asarray(w2).astype(matmul_dtype)
    whc = wh.astype(matmul_dtype)
    return (w1p, b1, w2c, b2, whc, bh), act_dim


@functools.partial(jax.jit, static_argnames=("act_dim",))
def actor_forward_packed(x, packed, act_dim):
    """x: (B, obs_dim) f32. Returns (mean, log_std), each (B, act_dim) f32."""
    w1, b1, w2, b2, wh, bh = packed
    B, K = x.shape
    k_pad = w1.shape[0]
    head_w = wh.shape[1]
    head_half = head_w // 2

    # pad feature dim to match the sublane-aligned fc1 weight
    if k_pad != K:
        x = jnp.pad(x, ((0, 0), (0, k_pad - K)))

    # batch tiling:
    #   B >= SPLIT_BATCH -> at least 2 grid steps (v7x megacore sharding),
    #   otherwise a single tile; tiles capped at MAX_BATCH_TILE rows.
    g = max(2, pl.cdiv(B, MAX_BATCH_TILE)) if B >= SPLIT_BATCH else 1
    tb = _round_up(pl.cdiv(B, g), 8)
    b_pad = g * tb
    if b_pad != B:
        x = jnp.pad(x, ((0, b_pad - B), (0, 0)))

    const = lambda i: (0, 0)   # weights stay resident in VMEM across the grid

    w_bytes = jnp.dtype(w1.dtype).itemsize
    weight_elems = k_pad * HIDDEN + HIDDEN * HIDDEN + HIDDEN * head_w
    cost = pl.CostEstimate(
        flops=2 * b_pad * weight_elems,
        transcendentals=b_pad * head_w,
        bytes_accessed=(b_pad * k_pad * 4
                        + weight_elems * w_bytes
                        + (2 * HIDDEN + head_w) * 4
                        + b_pad * head_w * jnp.dtype(OUT_DTYPE).itemsize),
    )

    out = pl.pallas_call(
        actor_kernel,
        out_shape=jax.ShapeDtypeStruct((b_pad, head_w), OUT_DTYPE),
        grid=(g,),
        in_specs=[
            pl.BlockSpec((tb, k_pad), lambda i: (i, 0)),          # x (streamed)
            pl.BlockSpec((k_pad, HIDDEN), const),                 # W1
            pl.BlockSpec((1, HIDDEN), const),                     # b1
            pl.BlockSpec((HIDDEN, HIDDEN), const),                # W2
            pl.BlockSpec((1, HIDDEN), const),                     # b2
            pl.BlockSpec((HIDDEN, head_w), const),                # fused head W
            pl.BlockSpec((1, head_w), const),                     # fused head b
        ],
        out_specs=pl.BlockSpec((tb, head_w), lambda i: (i, 0)),   # [mean | log_std]
        compiler_params=pltpu.CompilerParams(
            dimension_semantics=("parallel",),                    # v7x: shard across 2 TCs
        ),
        cost_estimate=cost,
    )(x, w1, b1, w2, b2, wh, bh)

    mean = out[:B, :act_dim]
    log_std = out[:B, head_half:head_half + act_dim]
    return mean.astype(jnp.float32), log_std.astype(jnp.float32)


def actor_forward(x, params, matmul_dtype=jnp.bfloat16):
    """Convenience wrapper taking unpacked (PyTorch-layout) params."""
    packed, act_dim = pack_actor_params(params, matmul_dtype)
    return actor_forward_packed(x, packed, act_dim)


def init_actor_params(key, obs_dim, act_dim):
    """Deterministic init mimicking nn.Linear's U(-1/sqrt(fan_in), 1/sqrt(fan_in))."""
    def linear(key, fan_in, fan_out):
        kw, kb = jax.random.split(key)
        bound = 1.0 / jnp.sqrt(jnp.float32(fan_in))
        w = jax.random.uniform(kw, (fan_in, fan_out), jnp.float32, -bound, bound)
        b = jax.random.uniform(kb, (1, fan_out), jnp.float32, -bound, bound)
        return w, b

    k1, k2, k3, k4 = jax.random.split(key, 4)
    w1, b1 = linear(k1, obs_dim, HIDDEN)
    w2, b2 = linear(k2, HIDDEN, HIDDEN)
    wm, bm = linear(k3, HIDDEN, act_dim)
    ws, bs = linear(k4, HIDDEN, act_dim)
    return (w1, b1, w2, b2, wm, bm, ws, bs)


def actor_forward_ref(x, params):
    """Plain-JAX f32 reference for correctness checking."""
    w1, b1, w2, b2, wm, bm, ws, bs = params
    h1 = jnp.maximum(x @ w1 + b1, 0.0)
    h2 = jnp.maximum(h1 @ w2 + b2, 0.0)
    mean = h2 @ wm + bm
    log_std = jnp.tanh(h2 @ ws + bs)
    log_std = LOG_STD_MIN + 0.5 * (LOG_STD_MAX - LOG_STD_MIN) * (log_std + 1.0)
    return mean, log_std


if __name__ == "__main__":
    key = jax.random.PRNGKey(0)
    k_params, k_x1, k_x2, k_x3 = jax.random.split(key, 4)

    obs_dim = 16   # e.g. flattened observation space
    act_dim = 4    # e.g. flattened action space

    params = init_actor_params(k_params, obs_dim, act_dim)

    # exact-precision packing (f32 matmuls) and default perf packing (bf16 matmuls)
    packed_f32, ad = pack_actor_params(params, matmul_dtype=jnp.float32)
    packed_bf16, _ = pack_actor_params(params, matmul_dtype=jnp.bfloat16)

    # batches: small aligned, ragged (padding path), and >= SPLIT_BATCH (2-step grid)
    for B, kx in ((8, k_x1), (37, k_x2), (260, k_x3)):
        x = jax.random.normal(kx, (B, obs_dim), dtype=jnp.float32)
        mean_ref, logstd_ref = actor_forward_ref(x, params)

        # f32 path: tight match to the reference
        m32, l32 = actor_forward_packed(x, packed_f32, ad)
        jax.block_until_ready((m32, l32))
        assert m32.shape == (B, act_dim) and l32.shape == (B, act_dim)
        assert jnp.allclose(m32, mean_ref, atol=1e-4, rtol=1e-4)
        assert jnp.allclose(l32, logstd_ref, atol=1e-4, rtol=1e-4)

        # bf16 path (default): loose tolerance vs the f32 reference
        mbf, lbf = actor_forward_packed(x, packed_bf16, ad)
        jax.block_until_ready((mbf, lbf))
        assert mbf.shape == (B, act_dim) and lbf.shape == (B, act_dim)
        assert jnp.allclose(mbf, mean_ref, atol=3e-2, rtol=3e-2)
        assert jnp.allclose(lbf, logstd_ref, atol=3e-2, rtol=3e-2)

    # TODO(synk): get_action's rsample / Normal.log_prob path (stochastic sampling)
    # is not part of forward() and is left to host-side JAX if needed.
    print("KERNEL_OK")
</pallas_src>

<mosaic_0001>
module attributes {stable_mosaic.version = 11 : i64} {
  func.func @actor_kernel(%arg0: i32, %arg1: memref<8x16xf32, #tpu.memory_space<vmem>>, %arg2: memref<16x256xf32, #tpu.memory_space<vmem>>, %arg3: memref<1x256xf32, #tpu.memory_space<vmem>>, %arg4: memref<256x256xf32, #tpu.memory_space<vmem>>, %arg5: memref<1x256xf32, #tpu.memory_space<vmem>>, %arg6: memref<256x128xf32, #tpu.memory_space<vmem>>, %arg7: memref<1x128xf32, #tpu.memory_space<vmem>>, %arg8: memref<8x128xf32, #tpu.memory_space<vmem>>) attributes {dimension_semantics = [#tpu.dimension_semantics<parallel>], iteration_bounds = array<i64: 1>, scalar_prefetch = 0 : i64, scratch_operands = 0 : i64, tpu.core_type = #tpu.core_type<tc>, window_params = [{transform_indices = @transform_0, window_bounds = array<i64: 8, 16>}, {pipeline_mode = #tpu.pipeline_mode<synchronous>, transform_indices = @transform_1, window_bounds = array<i64: 16, 256>}, {pipeline_mode = #tpu.pipeline_mode<synchronous>, transform_indices = @transform_2, window_bounds = array<i64: 1, 256>}, {pipeline_mode = #tpu.pipeline_mode<synchronous>, transform_indices = @transform_3, window_bounds = array<i64: 256, 256>}, {pipeline_mode = #tpu.pipeline_mode<synchronous>, transform_indices = @transform_4, window_bounds = array<i64: 1, 256>}, {pipeline_mode = #tpu.pipeline_mode<synchronous>, transform_indices = @transform_5, window_bounds = array<i64: 256, 128>}, {pipeline_mode = #tpu.pipeline_mode<synchronous>, transform_indices = @transform_6, window_bounds = array<i64: 1, 128>}, {transform_indices = @transform_7, window_bounds = array<i64: 8, 128>}]} {
    %c0 = arith.constant 0 : index
    %c0_0 = arith.constant 0 : index
    %0 = vector.load %arg2[%c0, %c0_0] : memref<16x256xf32, #tpu.memory_space<vmem>>, vector<16x256xf32>
    %c0_1 = arith.constant 0 : index
    %c0_2 = arith.constant 0 : index
    %1 = vector.load %arg1[%c0_1, %c0_2] : memref<8x16xf32, #tpu.memory_space<vmem>>, vector<8x16xf32>
    %cst = arith.constant dense<0.000000e+00> : vector<8x256xf32>
    %2 = tpu.matmul %1, %0, %cst {dimension_numbers = #tpu.dot_dimension_numbers<[1], [0], [0], [1], [0, 0, 1, 1], [], []>} : vector<8x16xf32>, vector<16x256xf32>, vector<8x256xf32> -> vector<8x256xf32>
    %c0_3 = arith.constant 0 : index
    %c0_4 = arith.constant 0 : index
    %3 = vector.load %arg3[%c0_3, %c0_4] : memref<1x256xf32, #tpu.memory_space<vmem>>, vector<1x256xf32>
    %4 = vector.broadcast %3 : vector<1x256xf32> to vector<8x256xf32>
    %5 = arith.addf %2, %4 : vector<8x256xf32>
    %cst_5 = arith.constant 0.000000e+00 : f32
    %6 = vector.broadcast %cst_5 : f32 to vector<8x256xf32>
    %7 = arith.maximumf %5, %6 : vector<8x256xf32>
    %c0_6 = arith.constant 0 : index
    %c0_7 = arith.constant 0 : index
    %8 = vector.load %arg4[%c0_6, %c0_7] : memref<256x256xf32, #tpu.memory_space<vmem>>, vector<256x256xf32>
    %cst_8 = arith.constant dense<0.000000e+00> : vector<8x256xf32>
    %9 = tpu.matmul %7, %8, %cst_8 {dimension_numbers = #tpu.dot_dimension_numbers<[1], [0], [0], [1], [0, 0, 1, 1], [], []>} : vector<8x256xf32>, vector<256x256xf32>, vector<8x256xf32> -> vector<8x256xf32>
    %c0_9 = arith.constant 0 : index
    %c0_10 = arith.constant 0 : index
    %10 = vector.load %arg5[%c0_9, %c0_10] : memref<1x256xf32, #tpu.memory_space<vmem>>, vector<1x256xf32>
    %11 = vector.broadcast %10 : vector<1x256xf32> to vector<8x256xf32>
    %12 = arith.addf %9, %11 : vector<8x256xf32>
    %cst_11 = arith.constant 0.000000e+00 : f32
    %13 = vector.broadcast %cst_11 : f32 to vector<8x256xf32>
    %14 = arith.maximumf %12, %13 : vector<8x256xf32>
    %c0_12 = arith.constant 0 : index
    %c0_13 = arith.constant 0 : index
    %15 = vector.load %arg6[%c0_12, %c0_13] : memref<256x128xf32, #tpu.memory_space<vmem>>, vector<256x128xf32>
    %cst_14 = arith.constant dense<0.000000e+00> : vector<8x128xf32>
    %16 = tpu.matmul %14, %15, %cst_14 {dimension_numbers = #tpu.dot_dimension_numbers<[1], [0], [0], [1], [0, 0, 1, 1], [], []>} : vector<8x256xf32>, vector<256x128xf32>, vector<8x128xf32> -> vector<8x128xf32>
    %c0_15 = arith.constant 0 : index
    %c0_16 = arith.constant 0 : index
    %17 = vector.load %arg7[%c0_15, %c0_16] : memref<1x128xf32, #tpu.memory_space<vmem>>, vector<1x128xf32>
    %18 = vector.broadcast %17 : vector<1x128xf32> to vector<8x128xf32>
    %19 = arith.addf %16, %18 : vector<8x128xf32>
    %20 = math.tanh %19 : vector<8x128xf32>
    %cst_17 = arith.constant 1.000000e+00 : f32
    %21 = vector.broadcast %cst_17 : f32 to vector<8x128xf32>
    %22 = arith.addf %20, %21 : vector<8x128xf32>
    %cst_18 = arith.constant 3.500000e+00 : f32
    %23 = vector.broadcast %cst_18 : f32 to vector<8x128xf32>
    %24 = arith.mulf %23, %22 : vector<8x128xf32>
    %cst_19 = arith.constant -5.000000e+00 : f32
    %25 = vector.broadcast %cst_19 : f32 to vector<8x128xf32>
    %26 = arith.addf %25, %24 : vector<8x128xf32>
    %27 = tpu.iota {dimensions = array<i32: 1>} : vector<8x128xi32>
    %c64_i32 = arith.constant 64 : i32
    %28 = vector.broadcast %c64_i32 : i32 to vector<8x128xi32>
    %29 = arith.cmpi sge, %27, %28 : vector<8x128xi32>
    %30 = arith.select %29, %26, %19 : vector<8x128xi1>, vector<8x128xf32>
    %c0_20 = arith.constant 0 : index
    %c0_21 = arith.constant 0 : index
    %31 = vector.load %arg8[%c0_20, %c0_21] : memref<8x128xf32, #tpu.memory_space<vmem>>, vector<8x128xf32>
    tpu.vector_store %arg8[%c0_20, %c0_21], %30 {strides = array<i32>} : memref<8x128xf32, #tpu.memory_space<vmem>>, vector<8x128xf32>,
    return
  }
  func.func @transform_0(%arg0: i32) -> (i32, i32) {
    %c0_i32 = arith.constant 0 : i32
    %c0_i32_0 = arith.constant 0 : i32
    return %arg0, %c0_i32 : i32, i32
  }
  func.func @transform_1(%arg0: i32) -> (i32, i32) {
    %c0_i32 = arith.constant 0 : i32
    %c0_i32_0 = arith.constant 0 : i32
    %c0_i32_1 = arith.constant 0 : i32
    return %c0_i32, %c0_i32_0 : i32, i32
  }
  func.func @transform_2(%arg0: i32) -> (i32, i32) {
    %c0_i32 = arith.constant 0 : i32
    %c0_i32_0 = arith.constant 0 : i32
    %c0_i32_1 = arith.constant 0 : i32
    return %c0_i32, %c0_i32_0 : i32, i32
  }
  func.func @transform_3(%arg0: i32) -> (i32, i32) {
    %c0_i32 = arith.constant 0 : i32
    %c0_i32_0 = arith.constant 0 : i32
    %c0_i32_1 = arith.constant 0 : i32
    return %c0_i32, %c0_i32_0 : i32, i32
  }
  func.func @transform_4(%arg0: i32) -> (i32, i32) {
    %c0_i32 = arith.constant 0 : i32
    %c0_i32_0 = arith.constant 0 : i32
    %c0_i32_1 = arith.constant 0 : i32
    return %c0_i32, %c0_i32_0 : i32, i32
  }
  func.func @transform_5(%arg0: i32) -> (i32, i32) {
    %c0_i32 = arith.constant 0 : i32
    %c0_i32_0 = arith.constant 0 : i32
    %c0_i32_1 = arith.constant 0 : i32
    return %c0_i32, %c0_i32_0 : i32, i32
  }
  func.func @transform_6(%arg0: i32) -> (i32, i32) {
    %c0_i32 = arith.constant 0 : i32
    %c0_i32_0 = arith.constant 0 : i32
    %c0_i32_1 = arith.constant 0 : i32
    return %c0_i32, %c0_i32_0 : i32, i32
  }
  func.func @transform_7(%arg0: i32) -> (i32, i32) {
    %c0_i32 = arith.constant 0 : i32
    %c0_i32_0 = arith.constant 0 : i32
    return %arg0, %c0_i32 : i32, i32
  }
}

</mosaic_0001>

<bundles_post_ra>
// kernel: actor_forward_packed.1
= control target key start
LH: loop header
LB: loop body
LE: loop exit
PB: predicated region body
PF: predicated region fallthrough
CT: control target
= control target key end

     0   :  { %12 = vsyncpa [#allocation3], 0  ;;  %s654_s0 = inlined_call_operand.hbm [shape: f32[8,16], index: 0, kind: input, shape index: {}]   ;;  %s655_s1 = inlined_call_operand.hbm [shape: f32[16,256], index: 1, kind: input, shape index: {}]   ;;  %s656_s2 = inlined_call_operand.vmem [shape: f32[1,256], index: 2, kind: input, shape index: {}]   ;;  %s657_s3 = inlined_call_operand.hbm [shape: f32[256,256], index: 3, kind: input, shape index: {}]   ;;  %s658_s4 = inlined_call_operand.vmem [shape: f32[1,256], index: 4, kind: input, shape index: {}]   ;;  %s659_s5 = inlined_call_operand.hbm [shape: f32[256,128], index: 5, kind: input, shape index: {}]   ;;  %s660_s6 = inlined_call_operand.vmem [shape: f32[1,128], index: 6, kind: input, shape index: {}]   ;;  %s661_s7 = inlined_call_operand.vmem [shape: f32[8,128], index: 7, kind: output, shape index: {}]  }
   0x1   :  { %13 = vsyncpa [#allocation5], 0 }
   0x2   :  { %14 = vsyncpa [#allocation8], 0  ;;  %s581_s24 = smov [#allocation4]  }
   0x3   :  { %s30_s25 = sshll.u32 %s581_s24, 4  ;;  %s31_s25 = int_to_ptr.vmem [resolvable:$true] %s30_s25 }
   0x4   :  { %s503_s26 = scalar_lea.vmem %s31_s25, 512  ;;  %p508_p1 = scmp.lt.s32.totalorder %s31_s25, %s31_s25 }
   0x5   :  { %p504_p0 = scmp.ne.s32.totalorder %s31_s25, %s503_s26  ;;  %p509_p2 = scmp.lt.s32.totalorder %s503_s26, %s503_s26 }
   0x7   :  { %p510_p3 = por %p509_p2, %p508_p1 }
   0x9   :  { %p511_p4 = pnand %p510_p3, %p504_p0 }
   0xb   :  { %514 = shalt.err (!%p511_p4)
}
   0xc   :  { %s582_s27 = smov 256   ;;  %s583_s28 = smov 16  }
   0xd   :  { %36 = dma.hbm_to_vmem [thread:$0]  %s655_s1, 512, %s31_s25, [#allocation5], %s582_s27, %s582_s27, %s583_s28  }
   0xe   :  { %s584_s8 = smov [#allocation2]   ;;  %s585_s10 = smov [#allocation6]  }
   0xf   :  { %s21_s9 = sshll.u32 %s584_s8, 4  ;;  %s44_s11 = sshll.u32 %s585_s10, 4  ;;  %s22_s9 = int_to_ptr.vmem [resolvable:$true] %s21_s9  ;;  %s45_s11 = int_to_ptr.vmem [resolvable:$true] %s44_s11 }
  0x10   :  { %s523_s12 = scalar_lea.vmem %s22_s9, 128  ;;  %p528_p6 = scmp.lt.s32.totalorder %s22_s9, %s22_s9 }
  0x11   :  { %p524_p5 = scmp.ne.s32.totalorder %s22_s9, %s523_s12  ;;  %p529_p7 = scmp.lt.s32.totalorder %s523_s12, %s523_s12 }
  0x13   :  { %p530_p8 = por %p529_p7, %p528_p6 }
  0x15   :  { %p531_p9 = pnand %p530_p8, %p524_p5 }
  0x17   :  { %534 = shalt.err (!%p531_p9)
}
  0x18   :  { %24 = dma.hbm_to_vmem [thread:$0]  %s654_s0, 128, %s22_s9, [#allocation3]  }
  0x19   :  { %s543_s15 = scalar_lea.vmem %s45_s11, 8192  ;;  %p548_p11 = scmp.lt.s32.totalorder %s45_s11, %s45_s11 }
  0x1a   :  { %p544_p10 = scmp.ne.s32.totalorder %s45_s11, %s543_s15  ;;  %p549_p12 = scmp.lt.s32.totalorder %s543_s15, %s543_s15 }
  0x1c   :  { %p550_p13 = por %p549_p12, %p548_p11 }
  0x1e   :  { %p551_p0 = pnand %p550_p13, %p544_p10 }
  0x20   :  { %554 = shalt.err (!%p551_p0)
}
  0x21   :  { %50 = dma.hbm_to_vmem [thread:$0]  %s657_s3, 8192, %s45_s11, [#allocation5], %s582_s27, %s582_s27, %s583_s28  }
  0x22   :  { %s586_s17 = smov [#allocation7]  }
  0x23   :  { %s58_s18 = sshll.u32 %s586_s17, 4  ;;  %s59_s18 = int_to_ptr.vmem [resolvable:$true] %s58_s18 }
  0x24   :  { %s563_s19 = scalar_lea.vmem %s59_s18, 4096  ;;  %p568_p2 = scmp.lt.s32.totalorder %s59_s18, %s59_s18 }
  0x25   :  { %p564_p1 = scmp.ne.s32.totalorder %s59_s18, %s563_s19  ;;  %p569_p3 = scmp.lt.s32.totalorder %s563_s19, %s563_s19 }
  0x27   :  { %p570_p4 = por %p569_p3, %p568_p2 }
  0x29   :  { %p571_p5 = pnand %p570_p4, %p564_p1 }
  0x2b   :  { %574 = shalt.err (!%p571_p5)
}
  0x2c   :  { %s587_s0 = smov 128   ;;  %s588_s20 = smov 8  }
  0x2d   :  { %64 = dma.hbm_to_vmem [thread:$0]  %s659_s5, 4096, %s59_s18, [#allocation8], %s587_s0, %s587_s0, %s588_s20  }
  0x2e   :  { %575 = dma.done.wait [#allocation3], 128  }
  0x2f   :  { %576 = vsyncadd [#allocation3], 4294967168 }
  0x30   :  { %577 = dma.done.wait [#allocation5], 8704  }
  0x31   :  { %578 = vsyncadd [#allocation5], 4294958592 }
  0x32   :  { %579 = dma.done.wait [#allocation8], 4096  }
  0x33   :  { %580 = vsyncadd [#allocation8], 4294963200  ;;  %v589_v0 = vmov 0.0   ;;  %v82_v1 = vld [vmem:[#allocation4 + $0x18] sm:$0xff]  ;;  %v81_v2 = vld [vmem:[#allocation4 + $0x10] sm:$0xff]  ;;  %vm96_vm0 = vcmask 130048  }
  0x34   :  { %164 = vmatprep.mubr.f32.mxu0 %v589_v0  ;;  %v80_v3 = vld [vmem:[#allocation4 + $0x8] sm:$0xff]  ;;  %128 = vmatprep.subr.mxu0 %v82_v1  ;;  %v79_v4 = vld [vmem:[#allocation4] sm:$0xff]  ;;  %v83_v5 = vld [vmem:[#allocation2] sm:$0xff] }
  0x35   :  { %v204_v6 = vld [vmem:[#allocation6 + $0xf8] sm:$0xff]  ;;  %129 = vmatpush1.msra.mxu0 %v81_v2  ;;  %v203_v7 = vld [vmem:[#allocation6 + $0xf0] sm:$0xff]  ;;  %v202_v8 = vld [vmem:[#allocation6 + $0xe8] sm:$0xff] }
  0x36   :  { %249 = vmatprep.subr.mxu1 %v204_v6  ;;  %v201_v9 = vld [vmem:[#allocation6 + $0xe0] sm:$0xff]  ;;  %130 = vmatprep.subr.mxu0 %v80_v3  ;;  %v200_v10 = vld [vmem:[#allocation6 + $0xd8] sm:$0xff]  ;;  %v199_v11 = vld [vmem:[#allocation6 + $0xd0] sm:$0xff] }
  0x37   :  { %250 = vmatpush1.msra.mxu1 %v203_v7  ;;  %131 = vmatpush1.msra.mxu0 %v79_v4  ;;  %v198_v12 = vld [vmem:[#allocation6 + $0xc8] sm:$0xff]  ;;  %v197_v13 = vld [vmem:[#allocation6 + $0xc0] sm:$0xff]  ;;  %v196_v14 = vld [vmem:[#allocation6 + $0xb8] sm:$0xff] }
  0x38   :  { %251 = vmatprep.subr.mxu1 %v202_v8  ;;  %447 = vmatmul.mubr.msk.f32.vlgmr.msra.gmra.mxu0 %vm96_vm0, %v83_v5  ;;  %v195_v15 = vld [vmem:[#allocation6 + $0xb0] sm:$0xff]  ;;  %v194_v16 = vld [vmem:[#allocation6 + $0xa8] sm:$0xff]  ;;  %v193_v17 = vld [vmem:[#allocation6 + $0xa0] sm:$0xff] }
  0x39   :  { %252 = vmatpush1.msra.mxu1 %v201_v9  ;;  %v192_v18 = vld [vmem:[#allocation6 + $0x98] sm:$0xff]  ;;  %v191_v19 = vld [vmem:[#allocation6 + $0x90] sm:$0xff]  ;;  %v190_v20 = vld [vmem:[#allocation6 + $0x88] sm:$0xff] }
  0x3a   :  { %253 = vmatprep.subr.mxu1 %v200_v10  ;;  %v189_v21 = vld [vmem:[#allocation6 + $0x80] sm:$0xff]  ;;  %v188_v22 = vld [vmem:[#allocation6 + $0x78] sm:$0xff]  ;;  %v187_v23 = vld [vmem:[#allocation6 + $0x70] sm:$0xff] }
  0x3b   :  { %254 = vmatpush1.msra.mxu1 %v199_v11  ;;  %v186_v24 = vld [vmem:[#allocation6 + $0x68] sm:$0xff]  ;;  %v185_v25 = vld [vmem:[#allocation6 + $0x60] sm:$0xff]  ;;  %v184_v26 = vld [vmem:[#allocation6 + $0x58] sm:$0xff] }
  0x3c   :  { %255 = vmatprep.subr.mxu1 %v198_v12  ;;  %v183_v27 = vld [vmem:[#allocation6 + $0x50] sm:$0xff]  ;;  %v182_v28 = vld [vmem:[#allocation6 + $0x48] sm:$0xff]  ;;  %v181_v29 = vld [vmem:[#allocation6 + $0x40] sm:$0xff] }
  0x3d   :  { %256 = vmatpush1.msra.mxu1 %v197_v13  ;;  %v180_v30 = vld [vmem:[#allocation6 + $0x38] sm:$0xff]  ;;  %v179_v31 = vld [vmem:[#allocation6 + $0x30] sm:$0xff]  ;;  %v178_v32 = vld [vmem:[#allocation6 + $0x28] sm:$0xff] }
  0x3e   :  { %257 = vmatprep.subr.mxu1 %v196_v14  ;;  %v177_v33 = vld [vmem:[#allocation6 + $0x20] sm:$0xff]  ;;  %v176_v34 = vld [vmem:[#allocation6 + $0x18] sm:$0xff]  ;;  %v175_v35 = vld [vmem:[#allocation6 + $0x10] sm:$0xff] }
  0x3f   :  { %258 = vmatpush1.msra.mxu1 %v195_v15  ;;  %v174_v36 = vld [vmem:[#allocation6 + $0x8] sm:$0xff]  ;;  %v173_v37 = vld [vmem:[#allocation6] sm:$0xff]  ;;  %v236_v38 = vld [vmem:[#allocation6 + $0x1f8] sm:$0xff] }
  0x40   :  { %259 = vmatprep.subr.mxu1 %v194_v16  ;;  %v235_v39 = vld [vmem:[#allocation6 + $0x1f0] sm:$0xff]  ;;  %v234_v40 = vld [vmem:[#allocation6 + $0x1e8] sm:$0xff]  ;;  %v233_v41 = vld [vmem:[#allocation6 + $0x1e0] sm:$0xff] }
  0x41   :  { %260 = vmatpush1.msra.mxu1 %v193_v17  ;;  %v232_v42 = vld [vmem:[#allocation6 + $0x1d8] sm:$0xff]  ;;  %v231_v43 = vld [vmem:[#allocation6 + $0x1d0] sm:$0xff]  ;;  %v230_v44 = vld [vmem:[#allocation6 + $0x1c8] sm:$0xff] }
  0x42   :  { %261 = vmatprep.subr.mxu1 %v192_v18  ;;  %v229_v45 = vld [vmem:[#allocation6 + $0x1c0] sm:$0xff]  ;;  %v228_v46 = vld [vmem:[#allocation6 + $0x1b8] sm:$0xff]  ;;  %v227_v47 = vld [vmem:[#allocation6 + $0x1b0] sm:$0xff] }
  0x43   :  { %262 = vmatpush1.msra.mxu1 %v191_v19  ;;  %v226_v48 = vld [vmem:[#allocation6 + $0x1a8] sm:$0xff]  ;;  %v225_v49 = vld [vmem:[#allocation6 + $0x1a0] sm:$0xff]  ;;  %v224_v50 = vld [vmem:[#allocation6 + $0x198] sm:$0xff] }
  0x44   :  { %263 = vmatprep.subr.mxu1 %v190_v20  ;;  %v223_v51 = vld [vmem:[#allocation6 + $0x190] sm:$0xff]  ;;  %v222_v52 = vld [vmem:[#allocation6 + $0x188] sm:$0xff]  ;;  %v221_v53 = vld [vmem:[#allocation6 + $0x180] sm:$0xff] }
  0x45   :  { %264 = vmatpush1.msra.mxu1 %v189_v21  ;;  %v220_v54 = vld [vmem:[#allocation6 + $0x178] sm:$0xff]  ;;  %v219_v55 = vld [vmem:[#allocation6 + $0x170] sm:$0xff]  ;;  %v218_v56 = vld [vmem:[#allocation6 + $0x168] sm:$0xff] }
  0x46   :  { %265 = vmatprep.subr.mxu1 %v188_v22  ;;  %v217_v57 = vld [vmem:[#allocation6 + $0x160] sm:$0xff]  ;;  %v216_v58 = vld [vmem:[#allocation6 + $0x158] sm:$0xff]  ;;  %v215_v59 = vld [vmem:[#allocation6 + $0x150] sm:$0xff] }
  0x47   :  { %266 = vmatpush1.msra.mxu1 %v187_v23  ;;  %v214_v60 = vld [vmem:[#allocation6 + $0x148] sm:$0xff]  ;;  %v213_v61 = vld [vmem:[#allocation6 + $0x140] sm:$0xff]  ;;  %v212_v62 = vld [vmem:[#allocation6 + $0x138] sm:$0xff] }
  0x48   :  { %267 = vmatprep.subr.mxu1 %v186_v24  ;;  %v211_v63 = vld [vmem:[#allocation6 + $0x130] sm:$0xff]  ;;  %v210_v0 = vld [vmem:[#allocation6 + $0x128] sm:$0xff]  ;;  %v209_v1 = vld [vmem:[#allocation6 + $0x120] sm:$0xff] }
  0x49   :  { %268 = vmatpush1.msra.mxu1 %v185_v25  ;;  %v208_v2 = vld [vmem:[#allocation6 + $0x118] sm:$0xff]  ;;  %v207_v3 = vld [vmem:[#allocation6 + $0x110] sm:$0xff]  ;;  %v206_v4 = vld [vmem:[#allocation6 + $0x108] sm:$0xff] }
  0x4a   :  { %269 = vmatprep.subr.mxu1 %v184_v26  ;;  %v205_v5 = vld [vmem:[#allocation6 + $0x100] sm:$0xff]  ;;  %v353_v6 = vld [vmem:[#allocation7 + $0xf8] sm:$0xff]  ;;  %v352_v8 = vld [vmem:[#allocation7 + $0xf0] sm:$0xff] }
  0x4b   :  { %270 = vmatpush1.msra.mxu1 %v183_v27  ;;  %v337_v7 = vld [vmem:[#allocation7 + $0x78] sm:$0xff]  ;;  %449 = vmatprep.subr.mxu0 %v353_v6  ;;  %v336_v9 = vld [vmem:[#allocation7 + $0x70] sm:$0xff]  ;;  %v351_v10 = vld [vmem:[#allocation7 + $0xe8] sm:$0xff] }
  0x4c   :  { %271 = vmatprep.subr.mxu1 %v182_v28  ;;  %450 = vmatpush3.msra.mxu0 %v337_v7  ;;  %v335_v11 = vld [vmem:[#allocation7 + $0x68] sm:$0xff]  ;;  %v350_v12 = vld [vmem:[#allocation7 + $0xe0] sm:$0xff]  ;;  %v349_v14 = vld [vmem:[#allocation7 + $0xd8] sm:$0xff] }
  0x4d   :  { %272 = vmatpush1.msra.mxu1 %v181_v29  ;;  %451 = vmatprep.subr.mxu0 %v352_v8  ;;  %v334_v13 = vld [vmem:[#allocation7 + $0x60] sm:$0xff]  ;;  %v333_v15 = vld [vmem:[#allocation7 + $0x58] sm:$0xff]  ;;  %v348_v16 = vld [vmem:[#allocation7 + $0xd0] sm:$0xff] }
  0x4e   :  { %273 = vmatprep.subr.mxu1 %v180_v30  ;;  %452 = vmatpush3.msra.mxu0 %v336_v9  ;;  %v332_v17 = vld [vmem:[#allocation7 + $0x50] sm:$0xff]  ;;  %v347_v18 = vld [vmem:[#allocation7 + $0xc8] sm:$0xff]  ;;  %v346_v20 = vld [vmem:[#allocation7 + $0xc0] sm:$0xff]  ;;  %v86_v30 = vlaneseq }
  0x4f   :  { %274 = vmatpush1.msra.mxu1 %v179_v31  ;;  %453 = vmatprep.subr.mxu0 %v351_v10  ;;  %v331_v19 = vld [vmem:[#allocation7 + $0x48] sm:$0xff]  ;;  %v330_v21 = vld [vmem:[#allocation7 + $0x40] sm:$0xff]  ;;  %v345_v22 = vld [vmem:[#allocation7 + $0xb8] sm:$0xff] }
  0x50   :  { %275 = vmatprep.subr.mxu1 %v178_v32  ;;  %454 = vmatpush3.msra.mxu0 %v335_v11  ;;  %v329_v23 = vld [vmem:[#allocation7 + $0x38] sm:$0xff]  ;;  %v344_v24 = vld [vmem:[#allocation7 + $0xb0] sm:$0xff]  ;;  %v343_v26 = vld [vmem:[#allocation7 + $0xa8] sm:$0xff]  ;;  %v87_v31 = vshrl.u32 %v86_v30, 7 }
  0x51   :  { %276 = vmatpush1.msra.mxu1 %v177_v33  ;;  %455 = vmatprep.subr.mxu0 %v350_v12  ;;  %v328_v25 = vld [vmem:[#allocation7 + $0x30] sm:$0xff]  ;;  %v327_v27 = vld [vmem:[#allocation7 + $0x28] sm:$0xff]  ;;  %v342_v28 = vld [vmem:[#allocation7 + $0xa0] sm:$0xff] }
  0x52   :  { %277 = vmatprep.subr.mxu1 %v176_v34  ;;  %456 = vmatpush3.msra.mxu0 %v334_v13  ;;  %v326_v29 = vld [vmem:[#allocation7 + $0x20] sm:$0xff]  ;;  %v88_v32 = vsub.s32 0, %v87_v31  ;;  %v84_v33 = vld [vmem:[%s656_s2] sm:$0x3]  ;;  %v92_v34 = vsub.s32 1, %v87_v31 }
  0x53   :  { %278 = vmatpush1.msra.mxu1 %v175_v35  ;;  %457 = vmatprep.subr.mxu0 %v349_v14 }
  0x54   :  { %279 = vmatprep.subr.mxu1 %v174_v36  ;;  %458 = vmatpush3.msra.mxu0 %v333_v15  ;;  %v89_v35 = vrot.slane %v84_v33, %v88_v32  ;;  %v93_v36 = vrot.slane %v84_v33, %v92_v34 }
  0x55   :  { %280 = vmatpush1.msra.mxu1 %v173_v37  ;;  %459 = vmatprep.subr.mxu0 %v348_v16 }
  0x56   :  { %281 = vmatprep.subr.mxu1 %v236_v38  ;;  %460 = vmatpush3.msra.mxu0 %v332_v17 }
  0x57   :  { %282 = vmatpush2.msra.mxu1 %v235_v39  ;;  %461 = vmatprep.subr.mxu0 %v347_v18 }
  0x58   :  { %283 = vmatprep.subr.mxu1 %v234_v40  ;;  %462 = vmatpush3.msra.mxu0 %v331_v19 }
  0x59   :  { %284 = vmatpush2.msra.mxu1 %v233_v41  ;;  %463 = vmatprep.subr.mxu0 %v346_v20 }
  0x5a   :  { %285 = vmatprep.subr.mxu1 %v232_v42  ;;  %464 = vmatpush3.msra.mxu0 %v330_v21 }
  0x5b   :  { %286 = vmatpush2.msra.mxu1 %v231_v43  ;;  %465 = vmatprep.subr.mxu0 %v345_v22  ;;  %v341_v43 = vld [vmem:[#allocation7 + $0x98] sm:$0xff] }
  0x5c   :  { %287 = vmatprep.subr.mxu1 %v230_v44  ;;  %466 = vmatpush3.msra.mxu0 %v329_v23  ;;  %v325_v44 = vld [vmem:[#allocation7 + $0x18] sm:$0xff] }
  0x5d   :  { %288 = vmatpush2.msra.mxu1 %v229_v45  ;;  %467 = vmatprep.subr.mxu0 %v344_v24  ;;  %v340_v45 = vld [vmem:[#allocation7 + $0x90] sm:$0xff] }
  0x5e   :  { %289 = vmatprep.subr.mxu1 %v228_v46  ;;  %468 = vmatpush3.msra.mxu0 %v328_v25  ;;  %v324_v46 = vld [vmem:[#allocation7 + $0x10] sm:$0xff] }
  0x5f   :  { %290 = vmatpush2.msra.mxu1 %v227_v47  ;;  %469 = vmatprep.subr.mxu0 %v343_v26  ;;  %v339_v47 = vld [vmem:[#allocation7 + $0x88] sm:$0xff] }
  0x60   :  { %291 = vmatprep.subr.mxu1 %v226_v48  ;;  %470 = vmatpush3.msra.mxu0 %v327_v27  ;;  %v323_v48 = vld [vmem:[#allocation7 + $0x8] sm:$0xff] }
  0x61   :  { %292 = vmatpush2.msra.mxu1 %v225_v49  ;;  %471 = vmatprep.subr.mxu0 %v342_v28  ;;  %v338_v49 = vld [vmem:[#allocation7 + $0x80] sm:$0xff] }
  0x62   :  { %293 = vmatprep.subr.mxu1 %v224_v50  ;;  %472 = vmatpush3.msra.mxu0 %v326_v29  ;;  %v322_v50 = vld [vmem:[#allocation7] sm:$0xff] }
  0x63   :  { %294 = vmatpush2.msra.mxu1 %v223_v51  ;;  %473 = vmatprep.subr.mxu0 %v341_v43  ;;  %v237_v51 = vld [vmem:[%s658_s4] sm:$0x3] }
  0x64   :  { %295 = vmatprep.subr.mxu1 %v222_v52  ;;  %474 = vmatpush3.msra.mxu0 %v325_v44  ;;  %v242_v52 = vrot.slane %v237_v51, %v88_v32 }
  0x65   :  { %296 = vmatpush2.msra.mxu1 %v221_v53  ;;  %475 = vmatprep.subr.mxu0 %v340_v45  ;;  %v246_v53 = vrot.slane %v237_v51, %v92_v34 }
  0x66   :  { %297 = vmatprep.subr.mxu1 %v220_v54  ;;  %476 = vmatpush3.msra.mxu0 %v324_v46 }
  0x67   :  { %298 = vmatpush2.msra.mxu1 %v219_v55  ;;  %477 = vmatprep.subr.mxu0 %v339_v47 }
  0x68   :  { %299 = vmatprep.subr.mxu1 %v218_v56  ;;  %478 = vmatpush3.msra.mxu0 %v323_v48 }
  0x69   :  { %300 = vmatpush2.msra.mxu1 %v217_v57  ;;  %479 = vmatprep.subr.mxu0 %v338_v49 }
  0x6a   :  { %301 = vmatprep.subr.mxu1 %v216_v58  ;;  %480 = vmatpush3.msra.mxu0 %v322_v50 }
  0x6b   :  { %302 = vmatpush2.msra.mxu1 %v215_v59 }
  0x6c   :  { %303 = vmatprep.subr.mxu1 %v214_v60 }
  0x6d   :  { %304 = vmatpush2.msra.mxu1 %v213_v61  ;;  %v448_v61 = vld [vmem:[%s660_s6] ss:$0 sm:$0xff] }
  0x6e   :  { %305 = vmatprep.subr.mxu1 %v212_v62 }
  0x6f   :  { %306 = vmatpush2.msra.mxu1 %v211_v63 }
  0x70   :  { %307 = vmatprep.subr.mxu1 %v210_v0 }
  0x71   :  { %308 = vmatpush2.msra.mxu1 %v209_v1 }
  0x72   :  { %309 = vmatprep.subr.mxu1 %v208_v2  ;;  %v436_v2 = vand.u32 127, %v86_v30 }
  0x73   :  { %310 = vmatpush2.msra.mxu1 %v207_v3 }
  0x74   :  { %311 = vmatprep.subr.mxu1 %v206_v4  ;;  %vm437_vm1 = vcmp.ge.s32.totalorder %v436_v2, 64 }
  0x75   :  { %312 = vmatpush2.msra.mxu1 %v205_v5 }
  0xf8   :  { %v166_v37 = vpop.f32.mrf.mxu0 }
  0xf9   :  { %v167_v38 = vadd.f32 %v166_v37, %v89_v35 }
  0xfa   :  { %v168_v39 = vpop.f32.mrf.mxu0 }
  0xfb   :  { %v169_v40 = vadd.f32 %v168_v39, %v93_v36  ;;  %v171_v42 = vmax.f32 %v167_v38, 0.0 }
  0xfd   :  { %v172_v41 = vmax.f32 %v169_v40, 0.0 }
  0xff   :  { %313 = vmatprep.mubr.f32.mxu1 %v172_v41 }
 0x100   :  { %314 = vmatmul.mubr.f32.vlgmr.msra.gmra.mxu1 %v171_v42 }
 0x1c0   :  { %v315_v54 = vpop.f32.mrf.mxu1 }
 0x1c1   :  { %v316_v55 = vadd.f32 %v315_v54, %v242_v52 }
 0x1c2   :  { %v317_v56 = vpop.f32.mrf.mxu1 }
 0x1c3   :  { %v318_v57 = vadd.f32 %v317_v56, %v246_v53  ;;  %v320_v59 = vmax.f32 %v316_v55, 0.0 }
 0x1c5   :  { %v321_v58 = vmax.f32 %v318_v57, 0.0 }
 0x1c7   :  { %425 = vmatprep.mubr.f32.mxu0 %v321_v58 }
 0x1c8   :  { %426 = vmatmul.mubr.f32.vlgmr.msra.gmra.mxu0 %v320_v59 }
 0x288   :  { %v481_v60 = vpop.f32.mrf.mxu0 }
 0x28a   :  { %v482_v62 = vpop.f32.mrf.mxu0 }
 0x28b   :  { %v483_v63 = vadd.f32 %v482_v62, %v481_v60 }
 0x28d   :  { %v428_v0 = vadd.f32 %v483_v63, %v448_v61 }
 0x28f   :  { %493 = vtanh.f32 %v428_v0 }
 0x29c   :  { %v494_v1 = vpop.eup %493 }
 0x29d   :  { %v432_v3 = vadd.f32 1.0, %v494_v1 }
 0x29f   :  { %v433_v4 = vmul.f32 3.5, %v432_v3 }
 0x2a1   :  { %v434_v5 = vadd.f32 -5.0, %v433_v4 }
 0x2a3   :  { %v438_v6 = vsel %vm437_vm1, %v434_v5, %v428_v0 }
 0x2a4   :  { %439 = vst [vmem:[%s661_s7] sm:$0xff] %v438_v6 }
 0x2a5   :  { %444 = vsyncpa [#allocation3], 1 }
 0x2a6   :  { %445 = vsyncpa [#allocation5], 1 }
 0x2a7   :  { %446 = vsyncpa [#allocation8], 1 }

</bundles_post_ra>
